<compile_context>
chip_gen: v5e
topology: v5e:2x2
jax: 0.10.0
libtpu: 0.0.40
codegen_flags: <defaults>
</compile_context>

<pallas_src>
import jax
import jax.numpy as jnp
from jax import lax
from jax.experimental import pallas as pl
from jax.experimental.pallas import tpu as pltpu

_LANES = 128  # lane width: pad the class dim to this


# --------------------------------------------------------------------------
# Kernel
# --------------------------------------------------------------------------
def _linear_kernel(x_ref, w_ref, o_ref):
    # x_ref: (TB, in_features)                streamed activation tile
    # w_ref: (in_features, padded_classes)    VMEM-resident bf16 weight
    # o_ref: (TB, padded_classes)             lane-dense f32 output tile
    x_bf16 = x_ref[...].astype(jnp.bfloat16)  # VPU cast, hidden under DMA
    o_ref[...] = lax.dot_general(
        x_bf16,
        w_ref[...],
        dimension_numbers=(((1,), (0,)), ((), ())),  # natural (M,K)x(K,N)
        preferred_element_type=jnp.float32,          # f32 accumulation
    )


# --------------------------------------------------------------------------
# Tiling / chip-generation helpers
# --------------------------------------------------------------------------
def _round_up(x, m):
    return ((x + m - 1) // m) * m


def _vmem_capacity_bytes():
    try:
        return pltpu.get_tpu_info().vmem_capacity_bytes
    except Exception:
        # Unknown -> assume the smallest per-core VMEM (v7x: 64 MiB).
        return 64 * 1024 * 1024


def _pick_tile(batch):
    big_vmem = _vmem_capacity_bytes() >= 96 * 1024 * 1024  # v5e/v6e: 128 MiB
    tb_max = 4096 if big_vmem else 2048
    vmem_limit = (64 if big_vmem else 32) * 1024 * 1024
    # Aim for >= ~4 grid steps at moderate batch sizes (keeps both v7x TCs
    # busy and gives each core pipeline depth); never below 256 rows and
    # never above the (8-rounded) batch itself.
    target = max(256, _round_up(pl.cdiv(batch, 4), 8))
    tb = min(tb_max, target, _round_up(batch, 8))
    return tb, vmem_limit


# --------------------------------------------------------------------------
# Weight preparation (do ONCE at init / parameter-load time)
# --------------------------------------------------------------------------
def prepare_weight(weight):
    """Pad + transpose a PyTorch-layout (num_classes, in_features) weight to a
    lane-dense (in_features, padded_classes) bf16 matrix.  Zero pad rows keep
    the padded logit columns exactly zero."""
    num_classes, in_features = weight.shape
    padded_classes = max(_LANES, _round_up(num_classes, _LANES))
    w = jnp.zeros((in_features, padded_classes), dtype=jnp.bfloat16)
    return w.at[:, :num_classes].set(weight.T.astype(jnp.bfloat16))


# --------------------------------------------------------------------------
# Forward pass
# --------------------------------------------------------------------------
def single_layer_classifier_padded(x, w_prepared):
    """Forward pass producing 128-padded logits (slice at the consumer).

    x:          (B, ...) any trailing shape flattening to in_features
    w_prepared: (in_features, padded_classes) bf16, from prepare_weight()
    returns     (B, padded_classes) float32 logits (cols >= num_classes are 0)
    """
    B = x.shape[0]
    in_features, padded_classes = w_prepared.shape
    x2d = x.reshape(B, -1)  # flatten view; keep source dtype (cast in-kernel)

    tb, vmem_limit = _pick_tile(B)
    grid = (pl.cdiv(B, tb),)

    return pl.pallas_call(
        _linear_kernel,
        out_shape=jax.ShapeDtypeStruct((B, padded_classes), jnp.float32),
        grid_spec=pltpu.PrefetchScalarGridSpec(
            num_scalar_prefetch=0,
            grid=grid,
            in_specs=[
                # Streamed activation tiles (double-buffered by Pallas).
                pl.BlockSpec((tb, in_features), lambda i: (i, 0)),
                # Weight: same block every step -> stays resident in VMEM.
                pl.BlockSpec((in_features, padded_classes), lambda i: (0, 0)),
            ],
            out_specs=pl.BlockSpec((tb, padded_classes), lambda i: (i, 0)),
        ),
        compiler_params=pltpu.CompilerParams(
            dimension_semantics=("parallel",),  # shard tiles across TCs (v7x)
            vmem_limit_bytes=vmem_limit,
        ),
    )(x2d, w_prepared)


def single_layer_classifier(x, weight):
    """Convenience wrapper matching the PyTorch module: weight is
    (num_classes, in_features); returns (B, num_classes) f32 logits.
    For the hot path, call prepare_weight() once and use the padded variant,
    slicing at the consumer so the slice fuses under jit."""
    num_classes = weight.shape[0]
    return single_layer_classifier_padded(x, prepare_weight(weight))[:, :num_classes]


def init_weights(key, input_size=784, num_classes=10):
    """Xavier (Glorot) uniform init, matching nn.init.xavier_uniform_."""
    bound = jnp.sqrt(6.0 / (input_size + num_classes))
    return jax.random.uniform(
        key, (num_classes, input_size), dtype=jnp.float32,
        minval=-bound, maxval=bound,
    )


if __name__ == "__main__":
    key = jax.random.PRNGKey(0)
    kx, kw = jax.random.split(key)

    # Small MNIST-like input: (batch=8, channels=1, 28, 28) -> flattens to 784.
    x = jax.random.normal(kx, (8, 1, 28, 28), dtype=jnp.float32)
    weight = init_weights(kw, input_size=784, num_classes=10)

    # Hot-path usage: prepare the weight once, slice at the consumer.
    w_prep = prepare_weight(weight)
    logits_padded = single_layer_classifier_padded(x, w_prep)
    logits = logits_padded[:, :10]  # consumer-side slice (fuses under jit)
    logits = jax.block_until_ready(logits)

    # Sanity check against a plain-JAX f32 reference (bf16 operand tolerance).
    ref = x.reshape(8, -1) @ weight.T
    assert logits.shape == (8, 10), logits.shape
    assert jnp.allclose(logits, ref, atol=5e-2, rtol=5e-2)
    # Padded columns must be exactly zero (zero pad columns in w_prep).
    assert jnp.all(logits_padded[:, 10:] == 0.0)

    print("KERNEL_OK")
</pallas_src>

<mosaic_0001>
module attributes {stable_mosaic.version = 11 : i64} {
  func.func @_linear_kernel(%arg0: i32, %arg1: memref<8x784xf32, #tpu.memory_space<vmem>>, %arg2: memref<784x128xbf16, #tpu.memory_space<vmem>>, %arg3: memref<8x128xf32, #tpu.memory_space<vmem>>) attributes {dimension_semantics = [#tpu.dimension_semantics<parallel>], iteration_bounds = array<i64: 1>, scalar_prefetch = 0 : i64, scratch_operands = 0 : i64, tpu.core_type = #tpu.core_type<tc>, window_params = [{transform_indices = @transform_0, window_bounds = array<i64: 8, 784>}, {pipeline_mode = #tpu.pipeline_mode<synchronous>, transform_indices = @transform_1, window_bounds = array<i64: 784, 128>}, {transform_indices = @transform_2, window_bounds = array<i64: 8, 128>}]} {
    %c0 = arith.constant 0 : index
    %c0_0 = arith.constant 0 : index
    %0 = vector.load %arg1[%c0, %c0_0] : memref<8x784xf32, #tpu.memory_space<vmem>>, vector<8x784xf32>
    %1 = arith.truncf %0 : vector<8x784xf32> to vector<8x784xbf16>
    %c0_1 = arith.constant 0 : index
    %c0_2 = arith.constant 0 : index
    %2 = vector.load %arg2[%c0_1, %c0_2] : memref<784x128xbf16, #tpu.memory_space<vmem>>, vector<784x128xbf16>
    %cst = arith.constant dense<0.000000e+00> : vector<8x128xf32>
    %3 = tpu.matmul %1, %2, %cst {dimension_numbers = #tpu.dot_dimension_numbers<[1], [0], [0], [1], [0, 0, 1, 1], [], []>} : vector<8x784xbf16>, vector<784x128xbf16>, vector<8x128xf32> -> vector<8x128xf32>
    %c0_3 = arith.constant 0 : index
    %c0_4 = arith.constant 0 : index
    %4 = vector.load %arg3[%c0_3, %c0_4] : memref<8x128xf32, #tpu.memory_space<vmem>>, vector<8x128xf32>
    tpu.vector_store %arg3[%c0_3, %c0_4], %3 {strides = array<i32>} : memref<8x128xf32, #tpu.memory_space<vmem>>, vector<8x128xf32>,
    return
  }
  func.func @transform_0(%arg0: i32) -> (i32, i32) {
    %c0_i32 = arith.constant 0 : i32
    %c0_i32_0 = arith.constant 0 : i32
    return %arg0, %c0_i32 : i32, i32
  }
  func.func @transform_1(%arg0: i32) -> (i32, i32) {
    %c0_i32 = arith.constant 0 : i32
    %c0_i32_0 = arith.constant 0 : i32
    %c0_i32_1 = arith.constant 0 : i32
    return %c0_i32, %c0_i32_0 : i32, i32
  }
  func.func @transform_2(%arg0: i32) -> (i32, i32) {
    %c0_i32 = arith.constant 0 : i32
    %c0_i32_0 = arith.constant 0 : i32
    return %arg0, %c0_i32 : i32, i32
  }
}

</mosaic_0001>

<bundles_post_ra>
// kernel: tpu_custom_call.1
= control target key start
LH: loop header
LB: loop body
LE: loop exit
PB: predicated region body
PF: predicated region fallthrough
CT: control target
= control target key end

     0   :  { %7 = vsyncpa [#allocation3], 0  ;;  %s921_s0 = inlined_call_operand.hbm [shape: f32[8,784], index: 0, kind: input, shape index: {}]   ;;  %s922_s1 = inlined_call_operand.hbm [shape: bf16[784,128], index: 1, kind: input, shape index: {}]   ;;  %s923_s2 = inlined_call_operand.hbm [shape: f32[8,128], index: 2, kind: output, shape index: {}]  }
   0x1   :  { %8 = vsyncpa [#allocation6], 0 }
   0x2   :  { %9 = vsyncpa [#allocation4], 0  ;;  %s15_s11 = sshll.u32 %s921_s0, 4  ;;  %s892_s12 = smov [#allocation2]   ;;  %s16_s11 = int_to_ptr.hbm [resolvable:$true] %s15_s11 }
   0x3   :  { %s17_s13 = sshll.u32 %s892_s12, 4  ;;  %s25_s16 = sshll.u32 %s922_s1, 4  ;;  %s18_s13 = int_to_ptr.vmem [resolvable:$true] %s17_s13  ;;  %s26_s16 = int_to_ptr.hbm [resolvable:$true] %s25_s16 }
   0x4   :  { %20 = dma.hbm_to_vmem [thread:$0]  %s16_s11, 896, %s18_s13, [#allocation3]  }
   0x5   :  { %s893_s17 = smov [#allocation5]   ;;  %s894_s19 = smov 64  }
   0x6   :  { %s27_s18 = sshll.u32 %s893_s17, 4  ;;  %s895_s20 = smov 4   ;;  %s28_s18 = int_to_ptr.vmem [resolvable:$true] %s27_s18 }
   0x7   :  { %33 = dma.hbm_to_vmem [thread:$0]  %s26_s16, 6272, %s28_s18, [#allocation6], %s894_s19, %s894_s19, %s895_s20  }
   0x8   :  { %886 = dma.done.wait [#allocation3], 896  }
   0x9   :  { %887 = vsyncadd [#allocation3], 4294966400 }
   0xa   :  { %888 = dma.done.wait [#allocation6], 6272  }
   0xb   :  { %889 = vsyncadd [#allocation6], 4294961024  ;;  %v767_v0 = vld [vmem:[#allocation5 + $0x38] sm:$0xff]  ;;  %v766_v3 = vld [vmem:[#allocation5 + $0x30] sm:$0xff]  ;;  %vm449_vm0 = vcmask 130048   ;;  %s896_s0 = smov [#allocation7]  }
   0xc   :  { %v775_v1 = vld [vmem:[#allocation5 + $0x78] sm:$0xff]  ;;  %453 = vmatpush.bf16.msra.mxu0 %v767_v0  ;;  %v774_v4 = vld [vmem:[#allocation5 + $0x70] sm:$0xff]  ;;  %v765_v8 = vld [vmem:[#allocation5 + $0x28] sm:$0xff]  ;;  %s550_s1 = sshll.u32 %s896_s0, 4  ;;  %s552_s23 = sshll.u32 %s923_s2, 4  ;;  %s551_s1 = int_to_ptr.vmem [resolvable:$true] %s550_s1  ;;  %s553_s23 = int_to_ptr.hbm [resolvable:$true] %s552_s23 }
   0xd   :  { %v783_v2 = vld [vmem:[#allocation5 + $0xb8] sm:$0xff]  ;;  %466 = vmatpush.bf16.msra.mxu1 %v775_v1  ;;  %v782_v5 = vld [vmem:[#allocation5 + $0xb0] sm:$0xff]  ;;  %v773_v9 = vld [vmem:[#allocation5 + $0x68] sm:$0xff] }
   0xe   :  { %479 = vmatpush.bf16.msra.mxu2 %v783_v2  ;;  %v791_v6 = vld [vmem:[#allocation5 + $0xf8] sm:$0xff]  ;;  %v790_v7 = vld [vmem:[#allocation5 + $0xf0] sm:$0xff]  ;;  %v781_v10 = vld [vmem:[#allocation5 + $0xa8] sm:$0xff] }
   0xf   :  { %492 = vmatpush.bf16.msra.mxu3 %v791_v6  ;;  %v789_v11 = vld [vmem:[#allocation5 + $0xe8] sm:$0xff]  ;;  %v764_v12 = vld [vmem:[#allocation5 + $0x20] sm:$0xff]  ;;  %v763_v16 = vld [vmem:[#allocation5 + $0x18] sm:$0xff] }
  0x10   :  { %454 = vmatpush.bf16.msra.mxu0 %v766_v3  ;;  %v772_v13 = vld [vmem:[#allocation5 + $0x60] sm:$0xff]  ;;  %v771_v17 = vld [vmem:[#allocation5 + $0x58] sm:$0xff]  ;;  %v762_v20 = vld [vmem:[#allocation5 + $0x10] sm:$0xff] }
  0x11   :  { %467 = vmatpush.bf16.msra.mxu1 %v774_v4  ;;  %v780_v14 = vld [vmem:[#allocation5 + $0xa0] sm:$0xff]  ;;  %v779_v18 = vld [vmem:[#allocation5 + $0x98] sm:$0xff]  ;;  %v770_v21 = vld [vmem:[#allocation5 + $0x50] sm:$0xff] }
  0x12   :  { %480 = vmatpush.bf16.msra.mxu2 %v782_v5  ;;  %v788_v15 = vld [vmem:[#allocation5 + $0xe0] sm:$0xff]  ;;  %v787_v19 = vld [vmem:[#allocation5 + $0xd8] sm:$0xff]  ;;  %v778_v22 = vld [vmem:[#allocation5 + $0x90] sm:$0xff] }
  0x13   :  { %493 = vmatpush.bf16.msra.mxu3 %v790_v7  ;;  %v786_v23 = vld [vmem:[#allocation5 + $0xd0] sm:$0xff]  ;;  %v761_v24 = vld [vmem:[#allocation5 + $0x8] sm:$0xff]  ;;  %v760_v27 = vld [vmem:[#allocation5] sm:$0xff] }
  0x14   :  { %455 = vmatpush.bf16.msra.mxu0 %v765_v8  ;;  %v769_v25 = vld [vmem:[#allocation5 + $0x48] sm:$0xff]  ;;  %v768_v29 = vld [vmem:[#allocation5 + $0x40] sm:$0xff]  ;;  %v44_v31 = vld [vmem:[#allocation2 + $0x8] sm:$0xff] }
  0x15   :  { %468 = vmatpush.bf16.msra.mxu1 %v773_v9  ;;  %v777_v26 = vld [vmem:[#allocation5 + $0x88] sm:$0xff]  ;;  %v776_v32 = vld [vmem:[#allocation5 + $0x80] sm:$0xff]  ;;  %v799_v33 = vld [vmem:[#allocation5 + $0x138] sm:$0xff]  ;;  %v51_v38 = vpack.c.bf16 %v44_v31, %v44_v31 }
  0x16   :  { %481 = vmatpush.bf16.msra.mxu2 %v781_v10  ;;  %v785_v28 = vld [vmem:[#allocation5 + $0xc8] sm:$0xff]  ;;  %v45_v34 = vld [vmem:[#allocation2 + $0x10] sm:$0xff]  ;;  %v808_v36 = vld [vmem:[#allocation5 + $0x180] sm:$0xff] }
  0x17   :  { %494 = vmatpush.bf16.msra.mxu3 %v789_v11  ;;  %v43_v30 = vld [vmem:[#allocation2] sm:$0xff]  ;;  %v807_v35 = vld [vmem:[#allocation5 + $0x178] sm:$0xff]  ;;  %v52_v39 = vpack.c.bf16 %v45_v34, %v45_v34  ;;  %v784_v40 = vld [vmem:[#allocation5 + $0xc0] sm:$0xff] }
  0x18   :  { %456 = vmatpush.bf16.msra.mxu0 %v764_v12  ;;  %v50_v37 = vpack.c.bf16 %v43_v30, %v43_v30  ;;  %v46_v41 = vld [vmem:[#allocation2 + $0x18] sm:$0xff]  ;;  %v798_v42 = vld [vmem:[#allocation5 + $0x130] sm:$0xff]  ;;  %v797_v45 = vld [vmem:[#allocation5 + $0x128] sm:$0xff] }
  0x19   :  { %469 = vmatpush.bf16.msra.mxu1 %v772_v13  ;;  %v806_v43 = vld [vmem:[#allocation5 + $0x170] sm:$0xff]  ;;  %v53_v44 = vpack.c.bf16 %v46_v41, %v46_v41  ;;  %v805_v46 = vld [vmem:[#allocation5 + $0x168] sm:$0xff]  ;;  %v796_v47 = vld [vmem:[#allocation5 + $0x120] sm:$0xff] }
  0x1a   :  { %482 = vmatpush.bf16.msra.mxu2 %v780_v14  ;;  %v804_v48 = vld [vmem:[#allocation5 + $0x160] sm:$0xff]  ;;  %v795_v49 = vld [vmem:[#allocation5 + $0x118] sm:$0xff]  ;;  %v794_v53 = vld [vmem:[#allocation5 + $0x110] sm:$0xff] }
  0x1b   :  { %495 = vmatpush.bf16.msra.mxu3 %v788_v15  ;;  %v49_v50 = vld [vmem:[#allocation2 + $0x30] sm:$0xff]  ;;  %v802_v54 = vld [vmem:[#allocation5 + $0x150] sm:$0xff]  ;;  %v793_v55 = vld [vmem:[#allocation5 + $0x108] sm:$0xff] }
  0x1c   :  { %457 = vmatpush.bf16.msra.mxu0 %v763_v16  ;;  %v803_v51 = vld [vmem:[#allocation5 + $0x158] sm:$0xff]  ;;  %v56_v52 = vpack.c.bf16 %v49_v50, %v49_v50  ;;  %v801_v56 = vld [vmem:[#allocation5 + $0x148] sm:$0xff]  ;;  %v792_v57 = vld [vmem:[#allocation5 + $0x100] sm:$0xff] }
  0x1d   :  { %470 = vmatpush.bf16.msra.mxu1 %v771_v17  ;;  %v47_v58 = vld [vmem:[#allocation2 + $0x20] sm:$0xff]  ;;  %v800_v59 = vld [vmem:[#allocation5 + $0x140] sm:$0xff]  ;;  %v48_v60 = vld [vmem:[#allocation2 + $0x28] sm:$0xff] }
  0x1e   :  { %483 = vmatpush.bf16.msra.mxu2 %v779_v18  ;;  %v54_v61 = vpack.c.bf16 %v47_v58, %v47_v58  ;;  %v55_v62 = vpack.c.bf16 %v48_v60, %v48_v60 }
  0x1f   :  { %496 = vmatpush.bf16.msra.mxu3 %v787_v19 }
  0x20   :  { %458 = vmatpush.bf16.msra.mxu0 %v762_v20 }
  0x21   :  { %471 = vmatpush.bf16.msra.mxu1 %v770_v21 }
  0x22   :  { %484 = vmatpush.bf16.msra.mxu2 %v778_v22 }
  0x23   :  { %497 = vmatpush.bf16.msra.mxu3 %v786_v23 }
  0x24   :  { %459 = vmatpush.bf16.msra.mxu0 %v761_v24 }
  0x25   :  { %472 = vmatpush.bf16.msra.mxu1 %v769_v25 }
  0x26   :  { %485 = vmatpush.bf16.msra.mxu2 %v777_v26 }
  0x27   :  { %498 = vmatpush.bf16.msra.mxu3 %v785_v28 }
  0x28   :  { %460 = vmatpush.bf16.msra.mxu0 %v760_v27 }
  0x29   :  { %473 = vmatpush.bf16.msra.mxu1 %v768_v29 }
  0x2a   :  { %486 = vmatpush.bf16.msra.mxu2 %v776_v32 }
  0x2b   :  { %461 = vmatmul.bf16.vlgmr.msra.gmra.mxu0 %v50_v37  ;;  %499 = vmatpush.bf16.msra.mxu3 %v784_v40 }
  0x2c   :  { %505 = vmatpush.bf16.msrb.mxu0 %v799_v33  ;;  %474 = vmatmul.bf16.vlgmr.msra.gmra.mxu1 %v51_v38 }
  0x2d   :  { %518 = vmatpush.bf16.msrb.mxu1 %v807_v35  ;;  %487 = vmatmul.bf16.vlgmr.msra.gmra.mxu2 %v52_v39 }
  0x2e   :  { %538 = vmatpush.bf16.msrb.mxu2 %v808_v36  ;;  %500 = vmatmul.bf16.vlgmr.msra.gmra.mxu3 %v53_v44 }
  0x30   :  { %506 = vmatpush.bf16.msrb.mxu0 %v798_v42 }
  0x31   :  { %519 = vmatpush.bf16.msrb.mxu1 %v806_v43 }
  0x34   :  { %507 = vmatpush.bf16.msrb.mxu0 %v797_v45 }
  0x35   :  { %520 = vmatpush.bf16.msrb.mxu1 %v805_v46 }
  0x38   :  { %508 = vmatpush.bf16.msrb.mxu0 %v796_v47 }
  0x39   :  { %521 = vmatpush.bf16.msrb.mxu1 %v804_v48 }
  0x3c   :  { %509 = vmatpush.bf16.msrb.mxu0 %v795_v49 }
  0x3d   :  { %522 = vmatpush.bf16.msrb.mxu1 %v803_v51  ;;  %759 = vmatmul.msk.bf16.vlgmr.msrb.gmra.mxu2 %vm449_vm0, %v56_v52 }
  0x40   :  { %510 = vmatpush.bf16.msrb.mxu0 %v794_v53 }
  0x41   :  { %523 = vmatpush.bf16.msrb.mxu1 %v802_v54 }
  0x44   :  { %511 = vmatpush.bf16.msrb.mxu0 %v793_v55 }
  0x45   :  { %524 = vmatpush.bf16.msrb.mxu1 %v801_v56 }
  0x48   :  { %512 = vmatpush.bf16.msrb.mxu0 %v792_v57 }
  0x49   :  { %525 = vmatpush.bf16.msrb.mxu1 %v800_v59 }
  0x4b   :  { %513 = vmatmul.bf16.vlgmr.msrb.gmra.mxu0 %v54_v61 }
  0x4c   :  { %526 = vmatmul.bf16.vlgmr.msrb.gmra.mxu1 %v55_v62 }
  0xa8   :  { %v462_v63 = vpop.f32.mrf.mxu0 }
  0xa9   :  { %v475_v0 = vpop.f32.mrf.mxu1 }
  0xaa   :  { %v476_v7 = vadd.f32 %v475_v0, %v462_v63 }
  0xb0   :  { %v488_v1 = vpop.f32.mrf.mxu2  ;;  %v464_v2 = vpop.f32.mrf.mxu0 }
  0xb1   :  { %v477_v3 = vpop.f32.mrf.mxu1  ;;  %v501_v4 = vpop.f32.mrf.mxu3  ;;  %v489_v9 = vadd.f32 %v488_v1, %v476_v7 }
  0xb3   :  { %v502_v10 = vadd.f32 %v501_v4, %v489_v9 }
  0xb8   :  { %v490_v5 = vpop.f32.mrf.mxu2 }
  0xb9   :  { %v503_v6 = vpop.f32.mrf.mxu3 }
  0xc0   :  { %v540_v8 = vpop.f32.mrf.mxu2 }
  0xc8   :  { %v514_v11 = vpop.f32.mrf.mxu0  ;;  %v542_v14 = vpop.f32.mrf.mxu2 }
  0xc9   :  { %v515_v12 = vadd.f32 %v514_v11, %v502_v10  ;;  %v527_v13 = vpop.f32.mrf.mxu1 }
  0xcb   :  { %v528_v15 = vadd.f32 %v527_v13, %v515_v12 }
  0xcd   :  { %v541_v16 = vadd.f32 %v540_v8, %v528_v15 }
  0xcf   :  { %544 = vst [vmem:[#allocation7] sm:$0xff] %v541_v16 }
  0xd0   :  { %v516_v17 = vpop.f32.mrf.mxu0  ;;  %555 = dma.vmem_to_hbm [thread:$0]  %s551_s1, 128, %s553_s23, [#allocation4]  }
  0xd1   :  { %v529_v18 = vpop.f32.mrf.mxu1 }
  0xd2   :  { %890 = dma.done.wait [#allocation4], 128  }
  0xd3   :  { %891 = vsyncadd [#allocation4], 4294967168 }
  0xd4   :  { %560 = vsyncpa [#allocation3], 1 }
  0xd5   :  { %561 = vsyncpa [#allocation6], 1 }
  0xd6   :  { %562 = vsyncpa [#allocation4], 1 }

</bundles_post_ra>
